<compile_context>
chip_gen: v7x
topology: tpu7x:2x2x1
jax: 0.10.0
libtpu: 0.0.40
codegen_flags: <defaults>
</compile_context>

<pallas_src>
from functools import partial

import jax
import jax.numpy as jnp
from jax.experimental import pallas as pl
from jax.experimental.pallas import tpu as pltpu


def _dvpde_kernel(xt_ref,                 # (F, T)  input tile, batch on lanes
                  w1t_ref, b1_ref,        # (H, F), (H, 1)   preprocessor Linear 1
                  w2t_ref, b2qw_ref,      # (Q, H), (Q, 1)   pre Linear 2 + folded quantum angles
                  w3t_ref, b3_ref,        # (H, Q), (H, 1)   postprocessor Linear 1
                  w4c_ref, b4_ref,        # (H, O), (O, 1)   postprocessor Linear 2
                  o_ref):                 # (O, T)  lane-dense output tile
    xt = xt_ref[...]                      # float32 already
    F = xt_ref.shape[0]
    Q = w3t_ref.shape[1]
    O = o_ref.shape[0]

    # ---- layer 1: contraction dim F is tiny -> VPU broadcast-FMAs, skip the MXU ----
    if F <= 8:
        w1t = w1t_ref[...]                                 # (H, F)
        h = b1_ref[...]                                    # (H, 1) broadcasts over lanes
        for f in range(F):                                 # static unroll
            h = h + w1t[:, f:f + 1] * xt[f:f + 1, :]       # (H,1)*(1,T) -> (H,T)
    else:
        h = jnp.dot(w1t_ref[...], xt,
                    preferred_element_type=jnp.float32) + b1_ref[...]
    h = jnp.tanh(h)                                        # (H, T)

    # ---- layer 2 on MXU; bias pre-folded with the quantum rotation angles ----
    pre = jnp.dot(w2t_ref[...], h, preferred_element_type=jnp.float32)    # (Q, T)

    # ---- quantum layer: angle encoding, per-qubit RY, <Z> readout ----
    q = jnp.cos(pre + b2qw_ref[...])                       # (Q, T)

    # ---- layer 3: contraction dim Q is tiny -> VPU broadcast-FMAs (off the MRF path) ----
    if Q <= 8:
        w3t = w3t_ref[...]                                 # (H, Q)
        h2 = b3_ref[...]                                   # (H, 1)
        for qi in range(Q):                                # static unroll
            h2 = h2 + w3t[:, qi:qi + 1] * q[qi:qi + 1, :]  # (H,1)*(1,T) -> (H,T)
    else:
        h2 = jnp.dot(w3t_ref[...], q,
                     preferred_element_type=jnp.float32) + b3_ref[...]
    h2 = jnp.tanh(h2)                                      # (H, T)

    # ---- layer 4: output dim tiny -> VPU multiply + sublane (XLU) reduce ----
    if O == 1:
        out = jnp.sum(w4c_ref[...] * h2, axis=0, keepdims=True) + b4_ref[...]   # (1, T)
    else:
        out = jax.lax.dot_general(w4c_ref[...], h2, (((0,), (0,)), ((), ())),
                                  preferred_element_type=jnp.float32) + b4_ref[...]
    o_ref[...] = out.astype(o_ref.dtype)                   # lane-dense store


def _pick_batch_tile(B):
    """Whole batch in one grid step when it fits; else big lane-aligned tiles."""
    if B <= 8192:
        return B
    for t in (8192, 4096, 2048, 1024, 512):
        if B % t == 0:
            return t
    return B      # ragged large batch: single big step (rare; VMEM limit raised below)


@partial(jax.jit, static_argnames=("batch_tile",))
def _dvpde_forward_jit(x, w1t, b1, w2t, b2qw, w3t, b3, w4c, b4, *, batch_tile):
    B, F = x.shape
    H = w1t.shape[0]
    Q = w2t.shape[0]
    O = w4c.shape[1]

    # Layout plumbing only; fused into this jit so there is no extra HBM pass.
    xt = x.T                                               # (F, B), batch on lanes
    grid = (B // batch_tile,)

    def full_spec(a):
        return pl.BlockSpec(a.shape, lambda i: (0, 0))

    weight_bytes = 4 * (w1t.size + b1.size + w2t.size + b2qw.size
                        + w3t.size + b3.size + w4c.size + b4.size)
    cost = pl.CostEstimate(
        flops=2 * B * (F * H + H * Q + Q * H + H * O),
        transcendentals=B * (2 * H + Q),
        bytes_accessed=4 * (B * F + B * O) + weight_bytes,
    )

    # VMEM budget: per-lane f32 footprint of x, out, h, q, h2 (+ headroom for
    # double-buffered I/O and temporaries); clamp to [16 MiB, 64 MiB] so large
    # tiles compile on v5e and stay within v7x physical VMEM.
    per_lane_bytes = 4 * (F + O + 2 * H + Q)
    vmem_limit = int(min(max(3 * batch_tile * per_lane_bytes + (2 << 20), 16 << 20),
                         64 << 20))

    out_t = pl.pallas_call(
        _dvpde_kernel,
        out_shape=jax.ShapeDtypeStruct((O, B), jnp.float32),
        grid_spec=pltpu.PrefetchScalarGridSpec(
            num_scalar_prefetch=0,
            grid=grid,
            in_specs=[
                pl.BlockSpec((F, batch_tile), lambda i: (0, i)),   # x tile (batch on lanes)
                full_spec(w1t), full_spec(b1),
                full_spec(w2t), full_spec(b2qw),
                full_spec(w3t), full_spec(b3),
                full_spec(w4c), full_spec(b4),
            ],
            out_specs=pl.BlockSpec((O, batch_tile), lambda i: (0, i)),
        ),
        compiler_params=pltpu.CompilerParams(
            # TODO(synk): evaluate pltpu.CORE_PARALLEL here on v7x (2 TCs/chip).
            dimension_semantics=("parallel",),
            vmem_limit_bytes=vmem_limit,
        ),
        cost_estimate=cost,
    )(xt, w1t, b1, w2t, b2qw, w3t, b3, w4c, b4)

    return out_t.T                                         # (B, O); trivial for O == 1


def dvpde_solver_forward(x, kparams, *, batch_tile=None):
    """Fused forward pass. x: (B, F) float32. Returns (B, O) float32."""
    B, F = x.shape
    if batch_tile is None:
        batch_tile = _pick_batch_tile(B)
    assert B % batch_tile == 0, "batch must be divisible by batch_tile"
    assert batch_tile == B or batch_tile % 128 == 0, \
        "batch_tile must be lane-aligned (multiple of 128) or the full batch"
    return _dvpde_forward_jit(x, *kparams, batch_tile=batch_tile)


def init_params(key, in_dim, hidden, num_qubits, out_dim):
    """Deterministic parameter init in kernel layout.

    Layers 1-3 weights are stored exactly as PyTorch nn.Linear: (out_features,
    in_features).  Layer 4 is stored transposed as (in_features, out_features);
    biases are column vectors (dim, 1).  Preprocessor linears: Xavier-normal
    weights, zero bias (matches _initialize_weights)."""
    ks = jax.random.split(key, 5)

    def xavier(k, fan_out, fan_in):
        std = (2.0 / (fan_in + fan_out)) ** 0.5
        return std * jax.random.normal(k, (fan_out, fan_in), dtype=jnp.float32)

    w1t = xavier(ks[0], hidden, in_dim)                    # (H, F)
    b1 = jnp.zeros((hidden, 1), jnp.float32)
    w2t = xavier(ks[1], num_qubits, hidden)                # (Q, H)
    b2 = jnp.zeros((num_qubits, 1), jnp.float32)
    qw = 0.1 * jax.random.normal(ks[2], (num_qubits, 1), dtype=jnp.float32)
    w3t = xavier(ks[3], hidden, num_qubits)                # (H, Q)
    b3 = jnp.zeros((hidden, 1), jnp.float32)
    w4c = xavier(ks[4], out_dim, hidden).T                 # (H, O)  <-- fixed shape
    b4 = jnp.zeros((out_dim, 1), jnp.float32)
    return (w1t, b1, w2t, b2, qw, w3t, b3, w4c, b4)


def fold_params(params):
    """One-time parameter fold: b2 + quantum angles -> single (Q, 1) constant."""
    w1t, b1, w2t, b2, qw, w3t, b3, w4c, b4 = params
    return (w1t, b1, w2t, b2 + qw, w3t, b3, w4c, b4)


def reference_forward(x, params):
    """Plain-JAX reference (batch-major math) for correctness checking."""
    w1t, b1, w2t, b2, qw, w3t, b3, w4c, b4 = params
    h = jnp.tanh(x @ w1t.T + b1.T)
    pre = h @ w2t.T + b2.T
    q = jnp.cos(pre + qw.T)
    h2 = jnp.tanh(q @ w3t.T + b3.T)
    return h2 @ w4c + b4.T


if __name__ == "__main__":
    # args-implied small shapes:
    #   classic_network = [2, 32, 1]  ->  in_dim=2, hidden=32, out_dim=1
    #   num_qubits = 4
    IN, HID, NQ, OUT = 2, 32, 4, 1

    key = jax.random.PRNGKey(0)
    kx1, kx2, kp = jax.random.split(key, 3)
    params = init_params(kp, IN, HID, NQ, OUT)
    kparams = fold_params(params)

    # Tiny batch: whole batch in one tile, grid=(1,).
    x_small = jax.random.normal(kx1, (16, IN), dtype=jnp.float32)
    out_small = jax.block_until_ready(dvpde_solver_forward(x_small, kparams))
    ref_small = reference_forward(x_small, params)
    assert out_small.shape == (16, OUT)
    assert jnp.allclose(out_small, ref_small, atol=1e-4, rtol=1e-4), "small-batch mismatch"

    # Larger batch: still a single full-batch grid step (B <= 8192).
    x_big = jax.random.normal(kx2, (1024, IN), dtype=jnp.float32)
    out_big = jax.block_until_ready(dvpde_solver_forward(x_big, kparams))
    ref_big = reference_forward(x_big, params)
    assert out_big.shape == (1024, OUT)
    assert jnp.allclose(out_big, ref_big, atol=1e-4, rtol=1e-4), "big-batch mismatch"

    print("KERNEL_OK")
</pallas_src>

<mosaic_0001>
module attributes {stable_mosaic.version = 11 : i64} {
  func.func @_dvpde_kernel(%arg0: i32, %arg1: memref<2x16xf32, #tpu.memory_space<vmem>>, %arg2: memref<32x2xf32, #tpu.memory_space<vmem>>, %arg3: memref<32x1xf32, #tpu.memory_space<vmem>>, %arg4: memref<4x32xf32, #tpu.memory_space<vmem>>, %arg5: memref<4x1xf32, #tpu.memory_space<vmem>>, %arg6: memref<32x4xf32, #tpu.memory_space<vmem>>, %arg7: memref<32x1xf32, #tpu.memory_space<vmem>>, %arg8: memref<32x1xf32, #tpu.memory_space<vmem>>, %arg9: memref<1x1xf32, #tpu.memory_space<vmem>>, %arg10: memref<1x16xf32, #tpu.memory_space<vmem>>) attributes {dimension_semantics = [#tpu.dimension_semantics<parallel>], iteration_bounds = array<i64: 1>, scalar_prefetch = 0 : i64, scratch_operands = 0 : i64, tpu.core_type = #tpu.core_type<tc>, window_params = [{transform_indices = @transform_0, window_bounds = array<i64: 2, 16>}, {pipeline_mode = #tpu.pipeline_mode<synchronous>, transform_indices = @transform_1, window_bounds = array<i64: 32, 2>}, {pipeline_mode = #tpu.pipeline_mode<synchronous>, transform_indices = @transform_2, window_bounds = array<i64: 32, 1>}, {pipeline_mode = #tpu.pipeline_mode<synchronous>, transform_indices = @transform_3, window_bounds = array<i64: 4, 32>}, {pipeline_mode = #tpu.pipeline_mode<synchronous>, transform_indices = @transform_4, window_bounds = array<i64: 4, 1>}, {pipeline_mode = #tpu.pipeline_mode<synchronous>, transform_indices = @transform_5, window_bounds = array<i64: 32, 4>}, {pipeline_mode = #tpu.pipeline_mode<synchronous>, transform_indices = @transform_6, window_bounds = array<i64: 32, 1>}, {pipeline_mode = #tpu.pipeline_mode<synchronous>, transform_indices = @transform_7, window_bounds = array<i64: 32, 1>}, {pipeline_mode = #tpu.pipeline_mode<synchronous>, transform_indices = @transform_8, window_bounds = array<i64: 1, 1>}, {transform_indices = @transform_9, window_bounds = array<i64: 1, 16>}]} {
    %c0 = arith.constant 0 : index
    %c0_0 = arith.constant 0 : index
    %0 = vector.load %arg1[%c0, %c0_0] : memref<2x16xf32, #tpu.memory_space<vmem>>, vector<2x16xf32>
    %c0_1 = arith.constant 0 : index
    %c0_2 = arith.constant 0 : index
    %1 = vector.load %arg2[%c0_1, %c0_2] : memref<32x2xf32, #tpu.memory_space<vmem>>, vector<32x2xf32>
    %c0_3 = arith.constant 0 : index
    %c0_4 = arith.constant 0 : index
    %2 = vector.load %arg3[%c0_3, %c0_4] : memref<32x1xf32, #tpu.memory_space<vmem>>, vector<32x1xf32>
    %3 = vector.extract_strided_slice %1 {offsets = [0, 0], sizes = [32, 1], strides = [1, 1]} : vector<32x2xf32> to vector<32x1xf32>
    %4 = vector.extract_strided_slice %0 {offsets = [0, 0], sizes = [1, 16], strides = [1, 1]} : vector<2x16xf32> to vector<1x16xf32>
    %5 = vector.broadcast %3 : vector<32x1xf32> to vector<32x16xf32>
    %6 = vector.broadcast %4 : vector<1x16xf32> to vector<32x16xf32>
    %7 = arith.mulf %5, %6 : vector<32x16xf32>
    %8 = vector.broadcast %2 : vector<32x1xf32> to vector<32x16xf32>
    %9 = arith.addf %8, %7 : vector<32x16xf32>
    %10 = vector.extract_strided_slice %1 {offsets = [0, 1], sizes = [32, 1], strides = [1, 1]} : vector<32x2xf32> to vector<32x1xf32>
    %11 = vector.extract_strided_slice %0 {offsets = [1, 0], sizes = [1, 16], strides = [1, 1]} : vector<2x16xf32> to vector<1x16xf32>
    %12 = vector.broadcast %10 : vector<32x1xf32> to vector<32x16xf32>
    %13 = vector.broadcast %11 : vector<1x16xf32> to vector<32x16xf32>
    %14 = arith.mulf %12, %13 : vector<32x16xf32>
    %15 = arith.addf %9, %14 : vector<32x16xf32>
    %16 = math.tanh %15 : vector<32x16xf32>
    %c0_5 = arith.constant 0 : index
    %c0_6 = arith.constant 0 : index
    %17 = vector.load %arg4[%c0_5, %c0_6] : memref<4x32xf32, #tpu.memory_space<vmem>>, vector<4x32xf32>
    %cst = arith.constant dense<0.000000e+00> : vector<4x16xf32>
    %18 = tpu.matmul %17, %16, %cst {dimension_numbers = #tpu.dot_dimension_numbers<[1], [0], [0], [1], [0, 0, 1, 1], [], []>} : vector<4x32xf32>, vector<32x16xf32>, vector<4x16xf32> -> vector<4x16xf32>
    %c0_7 = arith.constant 0 : index
    %c0_8 = arith.constant 0 : index
    %19 = vector.load %arg5[%c0_7, %c0_8] : memref<4x1xf32, #tpu.memory_space<vmem>>, vector<4x1xf32>
    %20 = vector.broadcast %19 : vector<4x1xf32> to vector<4x16xf32>
    %21 = arith.addf %18, %20 : vector<4x16xf32>
    %22 = math.cos %21 : vector<4x16xf32>
    %c0_9 = arith.constant 0 : index
    %c0_10 = arith.constant 0 : index
    %23 = vector.load %arg6[%c0_9, %c0_10] : memref<32x4xf32, #tpu.memory_space<vmem>>, vector<32x4xf32>
    %c0_11 = arith.constant 0 : index
    %c0_12 = arith.constant 0 : index
    %24 = vector.load %arg7[%c0_11, %c0_12] : memref<32x1xf32, #tpu.memory_space<vmem>>, vector<32x1xf32>
    %25 = vector.extract_strided_slice %23 {offsets = [0, 0], sizes = [32, 1], strides = [1, 1]} : vector<32x4xf32> to vector<32x1xf32>
    %26 = vector.extract_strided_slice %22 {offsets = [0, 0], sizes = [1, 16], strides = [1, 1]} : vector<4x16xf32> to vector<1x16xf32>
    %27 = vector.broadcast %25 : vector<32x1xf32> to vector<32x16xf32>
    %28 = vector.broadcast %26 : vector<1x16xf32> to vector<32x16xf32>
    %29 = arith.mulf %27, %28 : vector<32x16xf32>
    %30 = vector.broadcast %24 : vector<32x1xf32> to vector<32x16xf32>
    %31 = arith.addf %30, %29 : vector<32x16xf32>
    %32 = vector.extract_strided_slice %23 {offsets = [0, 1], sizes = [32, 1], strides = [1, 1]} : vector<32x4xf32> to vector<32x1xf32>
    %33 = vector.extract_strided_slice %22 {offsets = [1, 0], sizes = [1, 16], strides = [1, 1]} : vector<4x16xf32> to vector<1x16xf32>
    %34 = vector.broadcast %32 : vector<32x1xf32> to vector<32x16xf32>
    %35 = vector.broadcast %33 : vector<1x16xf32> to vector<32x16xf32>
    %36 = arith.mulf %34, %35 : vector<32x16xf32>
    %37 = arith.addf %31, %36 : vector<32x16xf32>
    %38 = vector.extract_strided_slice %23 {offsets = [0, 2], sizes = [32, 1], strides = [1, 1]} : vector<32x4xf32> to vector<32x1xf32>
    %39 = vector.extract_strided_slice %22 {offsets = [2, 0], sizes = [1, 16], strides = [1, 1]} : vector<4x16xf32> to vector<1x16xf32>
    %40 = vector.broadcast %38 : vector<32x1xf32> to vector<32x16xf32>
    %41 = vector.broadcast %39 : vector<1x16xf32> to vector<32x16xf32>
    %42 = arith.mulf %40, %41 : vector<32x16xf32>
    %43 = arith.addf %37, %42 : vector<32x16xf32>
    %44 = vector.extract_strided_slice %23 {offsets = [0, 3], sizes = [32, 1], strides = [1, 1]} : vector<32x4xf32> to vector<32x1xf32>
    %45 = vector.extract_strided_slice %22 {offsets = [3, 0], sizes = [1, 16], strides = [1, 1]} : vector<4x16xf32> to vector<1x16xf32>
    %46 = vector.broadcast %44 : vector<32x1xf32> to vector<32x16xf32>
    %47 = vector.broadcast %45 : vector<1x16xf32> to vector<32x16xf32>
    %48 = arith.mulf %46, %47 : vector<32x16xf32>
    %49 = arith.addf %43, %48 : vector<32x16xf32>
    %50 = math.tanh %49 : vector<32x16xf32>
    %c0_13 = arith.constant 0 : index
    %c0_14 = arith.constant 0 : index
    %51 = vector.load %arg8[%c0_13, %c0_14] : memref<32x1xf32, #tpu.memory_space<vmem>>, vector<32x1xf32>
    %52 = vector.broadcast %51 : vector<32x1xf32> to vector<32x16xf32>
    %53 = arith.mulf %52, %50 : vector<32x16xf32>
    %cst_15 = arith.constant dense<0.000000e+00> : vector<16xf32>
    %54 = vector.multi_reduction <add>, %53, %cst_15 [0] : vector<32x16xf32> to vector<16xf32>
    %55 = vector.shape_cast %54 : vector<16xf32> to vector<1x16xf32>
    %c0_16 = arith.constant 0 : index
    %c0_17 = arith.constant 0 : index
    %56 = vector.load %arg9[%c0_16, %c0_17] : memref<1x1xf32, #tpu.memory_space<vmem>>, vector<1x1xf32>
    %57 = vector.broadcast %56 : vector<1x1xf32> to vector<1x16xf32>
    %58 = arith.addf %55, %57 : vector<1x16xf32>
    %c0_18 = arith.constant 0 : index
    %c0_19 = arith.constant 0 : index
    %59 = vector.load %arg10[%c0_18, %c0_19] : memref<1x16xf32, #tpu.memory_space<vmem>>, vector<1x16xf32>
    tpu.vector_store %arg10[%c0_18, %c0_19], %58 {strides = array<i32>} : memref<1x16xf32, #tpu.memory_space<vmem>>, vector<1x16xf32>,
    return
  }
  func.func @transform_0(%arg0: i32) -> (i32, i32) {
    %c0_i32 = arith.constant 0 : i32
    %c0_i32_0 = arith.constant 0 : i32
    return %c0_i32, %arg0 : i32, i32
  }
  func.func @transform_1(%arg0: i32) -> (i32, i32) {
    %c0_i32 = arith.constant 0 : i32
    %c0_i32_0 = arith.constant 0 : i32
    %c0_i32_1 = arith.constant 0 : i32
    return %c0_i32, %c0_i32_0 : i32, i32
  }
  func.func @transform_2(%arg0: i32) -> (i32, i32) {
    %c0_i32 = arith.constant 0 : i32
    %c0_i32_0 = arith.constant 0 : i32
    %c0_i32_1 = arith.constant 0 : i32
    return %c0_i32, %c0_i32_0 : i32, i32
  }
  func.func @transform_3(%arg0: i32) -> (i32, i32) {
    %c0_i32 = arith.constant 0 : i32
    %c0_i32_0 = arith.constant 0 : i32
    %c0_i32_1 = arith.constant 0 : i32
    return %c0_i32, %c0_i32_0 : i32, i32
  }
  func.func @transform_4(%arg0: i32) -> (i32, i32) {
    %c0_i32 = arith.constant 0 : i32
    %c0_i32_0 = arith.constant 0 : i32
    %c0_i32_1 = arith.constant 0 : i32
    return %c0_i32, %c0_i32_0 : i32, i32
  }
  func.func @transform_5(%arg0: i32) -> (i32, i32) {
    %c0_i32 = arith.constant 0 : i32
    %c0_i32_0 = arith.constant 0 : i32
    %c0_i32_1 = arith.constant 0 : i32
    return %c0_i32, %c0_i32_0 : i32, i32
  }
  func.func @transform_6(%arg0: i32) -> (i32, i32) {
    %c0_i32 = arith.constant 0 : i32
    %c0_i32_0 = arith.constant 0 : i32
    %c0_i32_1 = arith.constant 0 : i32
    return %c0_i32, %c0_i32_0 : i32, i32
  }
  func.func @transform_7(%arg0: i32) -> (i32, i32) {
    %c0_i32 = arith.constant 0 : i32
    %c0_i32_0 = arith.constant 0 : i32
    %c0_i32_1 = arith.constant 0 : i32
    return %c0_i32, %c0_i32_0 : i32, i32
  }
  func.func @transform_8(%arg0: i32) -> (i32, i32) {
    %c0_i32 = arith.constant 0 : i32
    %c0_i32_0 = arith.constant 0 : i32
    %c0_i32_1 = arith.constant 0 : i32
    return %c0_i32, %c0_i32_0 : i32, i32
  }
  func.func @transform_9(%arg0: i32) -> (i32, i32) {
    %c0_i32 = arith.constant 0 : i32
    %c0_i32_0 = arith.constant 0 : i32
    return %c0_i32, %arg0 : i32, i32
  }
}

</mosaic_0001>

<bundles_post_ra>
// kernel: _dvpde_forward_jit.1
= control target key start
LH: loop header
LB: loop body
LE: loop exit
PB: predicated region body
PF: predicated region fallthrough
CT: control target
= control target key end

     0   :  { %s849_s0 = inlined_call_operand.vmem [shape: f32[2,16], index: 0, kind: input, shape index: {}]   ;;  %s850_s1 = inlined_call_operand.vmem [shape: f32[32,2], index: 1, kind: input, shape index: {}]   ;;  %s851_s2 = inlined_call_operand.vmem [shape: f32[32,1], index: 2, kind: input, shape index: {}]   ;;  %s852_s3 = inlined_call_operand.vmem [shape: f32[4,32], index: 3, kind: input, shape index: {}]   ;;  %s853_s4 = inlined_call_operand.vmem [shape: f32[4,1], index: 4, kind: input, shape index: {}]   ;;  %s854_s5 = inlined_call_operand.vmem [shape: f32[32,4], index: 5, kind: input, shape index: {}]   ;;  %s855_s6 = inlined_call_operand.vmem [shape: f32[32,1], index: 6, kind: input, shape index: {}]   ;;  %s856_s7 = inlined_call_operand.vmem [shape: f32[32,1], index: 7, kind: input, shape index: {}]   ;;  %s857_s8 = inlined_call_operand.<no memory space> [shape: f32[1,1], index: 8, kind: input, shape index: {}]   ;;  %s858_s9 = inlined_call_operand.hbm [shape: f32[1,16], index: 9, kind: output, shape index: {}]  }
   0x1   :  { %v14_v0 = vstv %s857_s8 }
   0x2   :  { %15 = vst [vmem:[#allocation2] sm:$0x1] %v14_v0 }
   0x3   :  { %v40_v1 = vld [vmem:[%s851_s2] sm:$0xff]  ;;  %v639_v3 = vmov 0   ;;  %v41_v4 = vld [vmem:[%s851_s2 + $0x8] sm:$0xff] }
   0x4   :  { %v36_v2 = vld [vmem:[%s850_s1] sm:$0xff]  ;;  %575 = vset.pattern.permute.xlu1 %v639_v3  ;;  %574 = vset.pattern.permute.xlu0 %v639_v3  ;;  %v37_v5 = vld [vmem:[%s850_s1 + $0x8] sm:$0xff] }
   0x5   :  { %74 = vperm.xlu1 %575, %v40_v1   ;;  %46 = vperm.xlu0 %574, %v36_v2  }
   0x6   :  { %16 = vsyncpa [#allocation4], 0  ;;  %v39_v6 = vld [vmem:[%s850_s1 + $0x18] sm:$0xff]  ;;  %v640_v7 = vmov 1   ;;  %v38_v8 = vld [vmem:[%s850_s1 + $0x10] sm:$0xff]  ;;  %v641_v12 = vmov 0.0|0.0   ;;  %v64_v29 = vlaneseq }
   0x7   :  { %v42_v9 = vld [vmem:[%s851_s2 + $0x10] sm:$0xff]  ;;  %v312_v10 = vld [vmem:[%s854_s5] sm:$0xff]  ;;  %v43_v11 = vld [vmem:[%s851_s2 + $0x18] sm:$0xff]  ;;  %550 = vmatprep.subr.bf16.mxu0 %v641_v12  ;;  %vm642_vm0 = vmmov 0   ;;  %v643_v13 = vmov 0.0   ;;  %v644_v20 = vmov 2  }
   0x8   :  { %547 = vmatprep.mubr.msk.f32.mxu0 %vm642_vm0, %v643_v13  ;;  %v129_v14 = vld [vmem:[%s853_s4] sm:$0xf]  ;;  %v313_v16 = vld [vmem:[%s854_s5 + $0x8] sm:$0xff]  ;;  %v318_v17 = vld [vmem:[%s855_s6 + $0x10] sm:$0xff]  ;;  %v645_v21 = vmov 3   ;;  %v779_v30 = vshrl.u32 %v64_v29, 7 }
   0x9   :  { %79 = vperm.xlu1 %575, %v41_v4   ;;  %51 = vperm.xlu0 %574, %v37_v5   ;;  %v316_v15 = vld [vmem:[%s855_s6] sm:$0xff]  ;;  %v314_v18 = vld [vmem:[%s854_s5 + $0x10] sm:$0xff]  ;;  %v317_v19 = vld [vmem:[%s855_s6 + $0x8] sm:$0xff]  ;;  %vm135_vm1 = vcmask 261120   ;;  %v649_v29 = vmov 2102212464  }
   0xa   :  { %v315_v22 = vld [vmem:[%s854_s5 + $0x18] sm:$0xff]  ;;  %v461_v23 = vld [vmem:[%s856_s7 + $0x8] sm:$0xff]  ;;  %v502_v24 = vld [vmem:[#allocation2] sm:$0x1]  ;;  %v782_v33 = vsub.s32 0, %v779_v30  ;;  %v114_v35 = vsub.s32 1, %v779_v30 }
   0xb   :  { %v319_v25 = vld [vmem:[%s855_s6 + $0x18] sm:$0xff]  ;;  %v460_v26 = vld [vmem:[%s856_s7] sm:$0xff]  ;;  %v462_v27 = vld [vmem:[%s856_s7 + $0x10] sm:$0xff]  ;;  %vm488_vm15 = vcmask 130048   ;;  %vm513_vm0 = vcmask 122880  }
   0xc   :  { %v463_v28 = vld [vmem:[%s856_s7 + $0x18] sm:$0xff]  ;;  %v35_v34 = vld [vmem:[%s849_s0] sm:$0x3] }
   0xd   :  { %576 = vset.pattern.permute.xlu1 %v640_v7  ;;  %61 = vperm.xlu0 %574, %v39_v6   ;;  %v67_v38 = vrot.slane %v35_v34, %v782_v33  ;;  %v115_v39 = vrot.slane %v35_v34, %v114_v35  ;;  %v650_v34 = vmov 920167782  }
   0xe   :  { %101 = vperm.xlu1 %576, %v37_v5  }
  0x11   :  { %578 = vset.pattern.permute.xlu0 %v640_v7 }
  0x12   :  { %577 = vset.pattern.permute.xlu1 %v639_v3  ;;  %97 = vperm.xlu0 %578, %v36_v2  }
  0x13   :  { %56 = vperm.xlu1 %577, %v38_v8  }
  0x16   :  { %105 = vperm.xlu0 %578, %v38_v8  }
  0x17   :  { %84 = vperm.xlu1 %577, %v42_v9  }
  0x1a   :  { %373 = vperm.xlu0 %578, %v312_v10  }
  0x1b   :  { %89 = vperm.xlu1 %577, %v43_v11  }
  0x1e   :  { %581 = vset.pattern.permute.xlu0 %v639_v3 }
  0x1f   :  { %579 = vset.pattern.permute.xlu1 %v640_v7  ;;  %322 = vperm.xlu0 %581, %v312_v10  }
  0x20   :  { %109 = vperm.xlu1 %579, %v39_v6   ;;  %v128_v6 = vld [vmem:[%s852_s3] sm:$0xf]  ;;  %s652_s3 = smov [#allocation3]  }
  0x21   :  { %s521_s27 = sshll.u32 %s652_s3, 4  ;;  %s522_s27 = int_to_ptr.vmem [resolvable:$true] %s521_s27 }
  0x22   :  { %s615_s1 = scalar_lea.vmem %s522_s27, 16  ;;  %s619_s28 = scalar_lea.vmem %s522_s27, 32 }
  0x23   :  { %350 = vperm.xlu0 %581, %v316_v15   ;;  %p616_p0 = scmp.ne.s32.totalorder %s522_s27, %s615_s1  ;;  %p620_p1 = scmp.lt.s32.totalorder %s522_s27, %s522_s27 }
  0x24   :  { %580 = vset.pattern.permute.xlu1 %v639_v3  ;;  %p621_p2 = scmp.lt.s32.totalorder %s619_s28, %s615_s1 }
  0x25   :  { %132 = vperm.xlu1 %580, %v129_v14  }
  0x26   :  { %p622_p3 = por %p621_p2, %p620_p1 }
  0x27   :  { %360 = vperm.xlu0 %581, %v318_v17  }
  0x28   :  { %p623_p4 = pnand %p622_p3, %p616_p0 }
  0x29   :  { %327 = vperm.xlu1 %580, %v313_v16  }
  0x2b   :  { %586 = vset.pattern.permute.xlu0 %v644_v20 }
  0x2c   :  { %405 = vperm.xlu0 %586, %v313_v16  }
  0x2d   :  { %332 = vperm.xlu1 %580, %v314_v18  }
  0x30   :  { %409 = vperm.xlu0 %586, %v314_v18  }
  0x31   :  { %355 = vperm.xlu1 %580, %v317_v19  }
  0x34   :  { %590 = vset.pattern.permute.xlu0 %v645_v21 }
  0x35   :  { %582 = vset.pattern.permute.xlu1 %v640_v7  ;;  %433 = vperm.xlu0 %590, %v313_v16  }
  0x36   :  { %377 = vperm.xlu1 %582, %v313_v16  }
  0x39   :  { %441 = vperm.xlu0 %590, %v315_v22  }
  0x3a   :  { %583 = vset.pattern.permute.xlu1 %v639_v3 }
  0x3b   :  { %337 = vperm.xlu1 %583, %v315_v22  }
  0x3d   :  { %594 = vset.pattern.permute.xlu0 %v639_v3 }
  0x3e   :  { %471 = vperm.xlu0 %594, %v461_v23   ;;  %v647_v23 = vmov 2475754826  }
  0x3f   :  { %584 = vset.pattern.permute.xlu1 %v640_v7 }
  0x40   :  { %381 = vperm.xlu1 %584, %v314_v18  }
  0x42   :  { %505 = vperm.xlu0 %594, %v502_v24  }
  0x44   :  { %585 = vset.pattern.permute.xlu1 %v644_v20 }
  0x45   :  { %401 = vperm.xlu1 %585, %v312_v10  }
  0x49   :  { %587 = vset.pattern.permute.xlu1 %v639_v3 }
  0x4a   :  { %365 = vperm.xlu1 %587, %v319_v25  }
  0x4e   :  { %588 = vset.pattern.permute.xlu1 %v640_v7 }
  0x4f   :  { %385 = vperm.xlu1 %588, %v315_v22  }
  0x53   :  { %589 = vset.pattern.permute.xlu1 %v645_v21 }
  0x54   :  { %429 = vperm.xlu1 %589, %v312_v10  }
  0x58   :  { %591 = vset.pattern.permute.xlu1 %v644_v20 }
  0x59   :  { %413 = vperm.xlu1 %591, %v315_v22  }
  0x5d   :  { %592 = vset.pattern.permute.xlu1 %v645_v21  ;;  %v646_v21 = vmov 683565275  }
  0x5e   :  { %437 = vperm.xlu1 %592, %v314_v18  }
  0x62   :  { %593 = vset.pattern.permute.xlu1 %v639_v3 }
  0x63   :  { %466 = vperm.xlu1 %593, %v460_v26   ;;  %v648_v26 = vmov 2131351028  }
  0x67   :  { %476 = vperm.xlu1 %593, %v462_v27  }
  0x6b   :  { %481 = vperm.xlu1 %593, %v463_v28  }
  0x84   :  { %v75_v31 = vpop.permute.xlu1 %74  ;;  %v47_v32 = vpop.permute.xlu0 %46 }
  0x85   :  { %v68_v43 = vmul.f32 %v67_v38, %v47_v32 }
  0x87   :  { %v92_v48 = vadd.f32 %v75_v31, %v68_v43 }
  0x88   :  { %v80_v36 = vpop.permute.xlu1 %79  ;;  %v52_v37 = vpop.permute.xlu0 %51 }
  0x89   :  { %v69_v40 = vmul.f32 %v67_v38, %v52_v37 }
  0x8b   :  { %v93_v45 = vadd.f32 %v80_v36, %v69_v40 }
  0x8c   :  { %v62_v41 = vpop.permute.xlu0 %61 }
  0x8d   :  { %v102_v42 = vpop.permute.xlu1 %101  ;;  %v71_v58 = vmul.f32 %v67_v38, %v62_v41 }
  0x8e   :  { %v117_v44 = vmul.f32 %v115_v39, %v102_v42 }
  0x90   :  { %v121_v46 = vadd.f32 %v117_v44, %v93_v45 }
  0x91   :  { %v98_v47 = vpop.permute.xlu0 %97 }
  0x92   :  { %v116_v49 = vmul.f32 %v115_v39, %v98_v47  ;;  %v57_v50 = vpop.permute.xlu1 %56  ;;  %595 = vtanh.f32 %v121_v46 }
  0x93   :  { %v70_v54 = vmul.f32 %v67_v38, %v57_v50  ;;  %v651_v38 = vmov 1326507024  }
  0x94   :  { %v120_v51 = vadd.f32 %v116_v49, %v92_v48 }
  0x95   :  { %v106_v53 = vpop.permute.xlu0 %105 }
  0x96   :  { %597 = vtanh.f32 %v120_v51  ;;  %v85_v52 = vpop.permute.xlu1 %84  ;;  %v118_v57 = vmul.f32 %v115_v39, %v106_v53 }
  0x97   :  { %v94_v56 = vadd.f32 %v85_v52, %v70_v54 }
  0x99   :  { %v122_v60 = vadd.f32 %v118_v57, %v94_v56 }
  0x9a   :  { %v90_v55 = vpop.permute.xlu1 %89 }
  0x9b   :  { %v95_v63 = vadd.f32 %v90_v55, %v71_v58  ;;  %599 = vtanh.f32 %v122_v60 }
  0x9c   :  { %v596_v59 = vpop.eup %595 }
  0x9f   :  { %v110_v61 = vpop.permute.xlu1 %109 }
  0xa0   :  { %v598_v62 = vpop.eup %597  ;;  %v119_v0 = vmul.f32 %v115_v39, %v110_v61 }
  0xa1   :  { %v551_v1 = vpack.c.bf16 %v596_v59, %v598_v62 }
  0xa2   :  { %v123_v2 = vadd.f32 %v119_v0, %v95_v63 }
  0xa3   :  { %552 = vmatpush3.bf16.msra.mxu0 %v551_v1 }
  0xa4   :  { %601 = vtanh.f32 %v123_v2  ;;  %553 = vmatprep.subr.bf16.mxu0 %v641_v12  ;;  %v133_v7 = vpop.permute.xlu1 %132 }
  0xa5   :  { %v600_v3 = vpop.eup %599 }
  0xa8   :  { %v807_v63 = vpop.permute.xlu1 %327 }
  0xae   :  { %v602_v4 = vpop.eup %601 }
  0xaf   :  { %v554_v5 = vpack.c.bf16 %v602_v4, %v600_v3 }
  0xb1   :  { %555 = vmatpush3.bf16.msra.mxu0 %v554_v5  ;;  %v812_v5 = vpop.permute.xlu1 %332 }
  0xb4   :  { %548 = vmatmul.mubr.msk.f32.vlgmr.msra.gmra.mrb[0].mxu0 %vm135_vm1, %v128_v6 }
 0x187   :  { %v205_v8 = vpop.f32.mrb[0].mxu0 }
 0x188   :  { %v795_v9 = vadd.f32 %v205_v8, %v133_v7  ;;  %v549_v10 = vpop.f32.mrb[1].mxu0 }
 0x189   :  { %v814_v10 = vpop.permute.xlu1 %355 }
 0x18a   :  { %v212_v11 = vand.u32 2139095040, %v795_v9  ;;  %v209_v15 = vand.u32 2147483647, %v795_v9  ;;  %vm211_vm9 = vcmp.lt.s32.totalorder %v795_v9, 0  ;;  %vm301_vm14 = vweird.f32 %v795_v9 }
 0x18c   :  { %v213_v13 = vshrl.u32 %v212_v11, 23  ;;  %v216_v18 = vand.u32 8388607, %v209_v15  ;;  %vm210_vm10 = vcmp.le.f32.partialorder %v209_v15, 0.7853982 }
 0x18e   :  { %v530_v14 = vadd.s32 4294967169, %v213_v13  ;;  %v217_v40 = vor.u32 8388608, %v216_v18 }
 0x190   :  { %v219_v12 = vadd.s32 1, %v530_v14  ;;  %v257_v54 = vshll.u32 %v217_v40, 8  ;;  %v816_v14 = vpop.permute.xlu1 %377 }
 0x192   :  { %vm220_vm2 = vcmp.gt.s32.totalorder %v219_v12, 0 }
 0x193   :  { %v221_v16 = vsel %vm220_vm2, %v219_v12, 0 }
 0x194   :  { %v223_v17 = vand.u32 31, %v221_v16  ;;  %v222_v20 = vshrl.u32 %v221_v16, 5  ;;  %v338_v18 = vpop.permute.xlu1 %337 }
 0x196   :  { %v224_v19 = vsub.s32 32, %v223_v17  ;;  %v226_v22 = vshll.u32 %v646_v21, %v223_v17  ;;  %v229_v24 = vshll.u32 %v647_v23, %v223_v17  ;;  %v232_v28 = vshll.u32 %v648_v26, %v223_v17 }
 0x197   :  { %v235_v32 = vshll.u32 %v649_v29, %v223_v17  ;;  %v238_v37 = vshll.u32 %v650_v34, %v223_v17  ;;  %vm241_vm3 = vcmp.lt.s32.totalorder %v222_v20, 1  ;;  %vm244_vm4 = vcmp.lt.s32.totalorder %v222_v20, 4 }
 0x198   :  { %v227_v25 = vshrl.u32 %v647_v23, %v224_v19  ;;  %v230_v27 = vshrl.u32 %v648_v26, %v224_v19  ;;  %v233_v31 = vshrl.u32 %v649_v29, %v224_v19  ;;  %v236_v36 = vshrl.u32 %v650_v34, %v224_v19 }
 0x199   :  { %v239_v39 = vshrl.u32 %v651_v38, %v224_v19  ;;  %v225_v49 = vshrl.u32 %v646_v21, %v224_v19  ;;  %vm243_vm5 = vcmp.lt.s32.totalorder %v222_v20, 3  ;;  %vm242_vm6 = vcmp.lt.s32.totalorder %v222_v20, 2  ;;  %v818_v19 = vpop.permute.xlu0 %373 }
 0x19a   :  { %v228_v41 = vor.u32 %v227_v25, %v226_v22  ;;  %v231_v42 = vor.u32 %v230_v27, %v229_v24  ;;  %v234_v43 = vor.u32 %v233_v31, %v232_v28  ;;  %v237_v44 = vor.u32 %v236_v36, %v235_v32  ;;  %v382_v27 = vpop.permute.xlu1 %381 }
 0x19b   :  { %v240_v45 = vor.u32 %v239_v39, %v238_v37 }
 0x19c   :  { %v246_v46 = vsel %vm244_vm4, %v234_v43, 2102212464  ;;  %v249_v47 = vsel %vm241_vm3, %v228_v41, %v231_v42  ;;  %v253_v48 = vsel %vm241_vm3, %v231_v42, %v234_v43  ;;  %v250_v50 = vsel %vm244_vm4, %v237_v44, 920167782 }
 0x19d   :  { %v254_v51 = vsel %vm244_vm4, %v240_v45, 1326507024  ;;  %v251_v52 = vsel %vm243_vm5, %v234_v43, %v250_v50  ;;  %v245_v55 = vsel %vm241_vm3, %v225_v49, %v228_v41  ;;  %v247_v56 = vsel %vm243_vm5, %v231_v42, %v246_v46  ;;  %v323_v28 = vpop.permute.xlu0 %322 }
 0x19e   :  { %v255_v53 = vsel %vm243_vm5, %v237_v44, %v254_v51  ;;  %v252_v57 = vsel %vm242_vm6, %v249_v47, %v251_v52  ;;  %v248_v0 = vsel %vm242_vm6, %v245_v55, %v247_v56  ;;  %v402_v37 = vpop.permute.xlu1 %401 }
 0x19f   :  { %v256_v58 = vsel %vm242_vm6, %v253_v48, %v255_v53  ;;  %v804_v61 = vmul.u32.u64.low %v257_v54, %v252_v57  ;;  %v805_v62 = vmul.u32.u64.high %v257_v54, %v252_v57, %v804_v61  ;;  %v264_v2 = vmul.u32 %v257_v54, %v248_v0 }
 0x1a0   :  { %v801_v59 = vmul.u32.u64.low %v257_v54, %v256_v58  ;;  %v802_v60 = vmul.u32.u64.high %v257_v54, %v256_v58, %v801_v59 }
 0x1a1   :  { %v267_v1 = vadd.s32 1, %v805_v62  ;;  %v351_v38 = vpop.permute.xlu0 %350  ;;  %v418_v59 = vsub.s32 2, %v779_v30 }
 0x1a2   :  { %vm266_vm7 = vc.u32 %v802_v60, %v804_v61  ;;  %v265_v21 = vadd.s32 %v804_v61, %v802_v60  ;;  %v366_v44 = vpop.permute.xlu1 %365  ;;  %v446_v61 = vsub.s32 3, %v779_v30 }
 0x1a3   :  { %v268_v3 = vsel %vm266_vm7, %v267_v1, %v805_v62 }
 0x1a4   :  { %v269_v4 = vadd.s32 %v268_v3, %v264_v2 }
 0x1a5   :  { %v361_v45 = vpop.permute.xlu0 %360 }
 0x1a6   :  { %v270_v6 = vadd.s32 536870912, %v269_v4  ;;  %v386_v48 = vpop.permute.xlu1 %385 }
 0x1a8   :  { %v271_v7 = vshrl.u32 %v270_v6, 30 }
 0x1a9   :  { %v406_v49 = vpop.permute.xlu0 %405 }
 0x1aa   :  { %v272_v8 = vshll.u32 %v271_v7, 30  ;;  %v295_v42 = vsub.s32 4, %v271_v7  ;;  %v430_v54 = vpop.permute.xlu1 %429 }
 0x1ac   :  { %v273_v11 = vsub.s32 %v269_v4, %v272_v8  ;;  %v296_v46 = vsel %vm211_vm9, %v295_v42, %v271_v7 }
 0x1ad   :  { %v298_v47 = vsel %vm210_vm10, 0, %v296_v46  ;;  %v410_v55 = vpop.permute.xlu0 %409 }
 0x1ae   :  { %v275_v13 = vsub.s32 0, %v273_v11  ;;  %v302_v50 = vand.u32 3, %v298_v47  ;;  %v414_v1 = vpop.permute.xlu1 %413 }
 0x1b0   :  { %v531_v12 = vmin.u32 %v275_v13, %v273_v11  ;;  %vm307_vm11 = vcmp.eq.s32.totalorder %v302_v50, 2  ;;  %vm304_vm12 = vcmp.eq.s32.totalorder %v302_v50, 0  ;;  %vm303_vm13 = vcmp.lt.s32.totalorder %v302_v50, 2 }
 0x1b1   :  { %v434_v2 = vpop.permute.xlu0 %433 }
 0x1b2   :  { %v277_v16 = vclz %v531_v12 }
 0x1b4   :  { %v532_v17 = vadd.s32 4294967294, %v277_v16 }
 0x1b6   :  { %vm533_vm8 = vcmp.lt.s32.totalorder %v532_v17, 0 }
 0x1b7   :  { %v280_v20 = vsel %vm533_vm8, 0, %v532_v17 }
 0x1b8   :  { %v281_v22 = vsub.s32 32, %v280_v20  ;;  %v285_v23 = vsub.s32 4294967266, %v280_v20  ;;  %v282_v24 = vshll.u32 %v273_v11, %v280_v20 }
 0x1ba   :  { %v283_v25 = vshrl.u32 %v265_v21, %v281_v22  ;;  %v286_v26 = vadd.s32 127, %v285_v23  ;;  %v438_v23 = vpop.permute.xlu1 %437 }
 0x1bc   :  { %v284_v29 = vor.u32 %v283_v25, %v282_v24  ;;  %v287_v31 = vshll.u32 %v286_v26, 23  ;;  %v442_v24 = vpop.permute.xlu0 %441 }
 0x1be   :  { %v288_v32 = vor.u32 4788187, %v287_v31  ;;  %v291_v36 = vcvt.s32.f32 %v284_v29 }
 0x1c0   :  { %v289_v34 = vand.u32 2147483647, %v288_v32 }
 0x1c2   :  { %v292_v39 = vmul.f32 %v291_v36, %v289_v34 }
 0x1c4   :  { %v293_v40 = vxor.u32 2147483648, %v292_v39 }
 0x1c6   :  { %v294_v41 = vsel %vm211_vm9, %v293_v40, %v292_v39 }
 0x1c7   :  { %v297_v43 = vsel %vm210_vm10, %v795_v9, %v294_v41  ;;  %v467_v41 = vpop.permute.xlu1 %466 }
 0x1c8   :  { %603 = vcosq.f32 %v297_v43 }
 0x1c9   :  { %605 = vsinq.f32 %v297_v43  ;;  %v472_v43 = vpop.permute.xlu0 %471 }
 0x1d2   :  { %v604_v51 = vpop.eup %603 }
 0x1d3   :  { %v606_v52 = vpop.eup %605  ;;  %v308_v53 = vxor.u32 2147483648, %v604_v51 }
 0x1d4   :  { %v305_v56 = vxor.u32 2147483648, %v606_v52 }
 0x1d5   :  { %v309_v15 = vsel %vm307_vm11, %v308_v53, %v606_v52 }
 0x1d6   :  { %v306_v57 = vsel %vm304_vm12, %v604_v51, %v305_v56 }
 0x1d7   :  { %v310_v58 = vsel %vm303_vm13, %v306_v57, %v309_v15 }
 0x1d8   :  { %v311_v60 = vsel %vm301_vm14, nan, %v310_v58 }
 0x1d9   :  { %v343_v62 = vrot.slane %v311_v60, %v782_v33  ;;  %v391_v0 = vrot.slane %v311_v60, %v114_v35  ;;  %v419_v6 = vrot.slane %v311_v60, %v418_v59  ;;  %v447_v8 = vrot.slane %v311_v60, %v446_v61 }
 0x1db   :  { %v345_v3 = vmul.f32 %v343_v62, %v807_v63  ;;  %v347_v4 = vmul.f32 %v343_v62, %v338_v18  ;;  %v344_v7 = vmul.f32 %v343_v62, %v323_v28  ;;  %v346_v9 = vmul.f32 %v343_v62, %v812_v5  ;;  %v506_v62 = vpop.permute.xlu0 %505 }
 0x1dc   :  { %v393_v13 = vmul.f32 %v391_v0, %v816_v14  ;;  %v395_v16 = vmul.f32 %v391_v0, %v386_v48  ;;  %v394_v17 = vmul.f32 %v391_v0, %v382_v27  ;;  %v392_v30 = vmul.f32 %v391_v0, %v818_v19 }
 0x1dd   :  { %v369_v11 = vadd.f32 %v814_v10, %v345_v3  ;;  %v371_v12 = vadd.f32 %v366_v44, %v347_v4  ;;  %v368_v20 = vadd.f32 %v351_v38, %v344_v7  ;;  %v370_v35 = vadd.f32 %v361_v45, %v346_v9 }
 0x1de   :  { %v421_v63 = vmul.f32 %v419_v6, %v406_v49  ;;  %v423_v18 = vmul.f32 %v419_v6, %v414_v1  ;;  %v420_v25 = vmul.f32 %v419_v6, %v402_v37  ;;  %v422_v28 = vmul.f32 %v419_v6, %v410_v55  ;;  %v477_v37 = vpop.permute.xlu1 %476 }
 0x1df   :  { %v397_v21 = vadd.f32 %v393_v13, %v369_v11  ;;  %v399_v22 = vadd.f32 %v395_v16, %v371_v12  ;;  %v396_v5 = vadd.f32 %v392_v30, %v368_v20  ;;  %v398_v26 = vadd.f32 %v394_v17, %v370_v35 }
 0x1e0   :  { %v448_v29 = vmul.f32 %v447_v8, %v430_v54  ;;  %v449_v31 = vmul.f32 %v447_v8, %v434_v2  ;;  %v450_v34 = vmul.f32 %v447_v8, %v438_v23  ;;  %v451_v36 = vmul.f32 %v447_v8, %v442_v24 }
 0x1e1   :  { %v425_v10 = vadd.f32 %v421_v63, %v397_v21  ;;  %v427_v14 = vadd.f32 %v423_v18, %v399_v22  ;;  %v424_v32 = vadd.f32 %v420_v25, %v396_v5  ;;  %v426_v27 = vadd.f32 %v422_v28, %v398_v26 }
 0x1e2   :  { %v482_v50 = vpop.permute.xlu1 %481  ;;  %v511_v2 = vrot.slane %v506_v62, %v782_v33 }
 0x1e3   :  { %v453_v19 = vadd.f32 %v449_v31, %v425_v10  ;;  %v452_v38 = vadd.f32 %v448_v29, %v424_v32  ;;  %v454_v39 = vadd.f32 %v450_v34, %v426_v27  ;;  %v455_v40 = vadd.f32 %v451_v36, %v427_v14 }
 0x1e5   :  { %607 = vtanh.f32 %v453_v19 }
 0x1e6   :  { %609 = vtanh.f32 %v452_v38 }
 0x1e7   :  { %611 = vtanh.f32 %v454_v39 }
 0x1e8   :  { %613 = vtanh.f32 %v455_v40 }
 0x1ef   :  { %v608_v42 = vpop.eup %607 }
 0x1f0   :  { %v610_v44 = vpop.eup %609  ;;  %v485_v45 = vmul.f32 %v608_v42, %v472_v43 }
 0x1f1   :  { %v612_v46 = vpop.eup %611  ;;  %v484_v47 = vmul.f32 %v610_v44, %v467_v41 }
 0x1f2   :  { %v614_v48 = vpop.eup %613  ;;  %v486_v49 = vmul.f32 %v612_v46, %v477_v37  ;;  %v490_v51 = vsel %vm488_vm15, %v485_v45, 0.0 }
 0x1f3   :  { %v489_v52 = vsel %vm488_vm15, %v484_v47, 0.0  ;;  %v487_v53 = vmul.f32 %v614_v48, %v482_v50 }
 0x1f4   :  { %v491_v54 = vadd.f32 %v490_v51, %v489_v52  ;;  %v492_v55 = vsel %vm488_vm15, %v486_v49, 0.0 }
 0x1f5   :  { %v494_v15 = vsel %vm488_vm15, %v487_v53, 0.0 }
 0x1f6   :  { %v493_v56 = vadd.f32 %v492_v55, %v491_v54 }
 0x1f8   :  { %v495_v57 = vadd.f32 %v494_v15, %v493_v56 }
 0x1fa   :  { %v496_v58 = vrot.slane %v495_v57, 4 }
 0x1fc   :  { %v497_v59 = vadd.f32 %v496_v58, %v495_v57 }
 0x1fe   :  { %v498_v60 = vrot.slane %v497_v59, 2 }
 0x200   :  { %v499_v61 = vadd.f32 %v498_v60, %v497_v59 }
 0x202   :  { %v500_v0 = vrot.slane %v499_v61, 1 }
 0x204   :  { %v501_v1 = vadd.f32 %v500_v0, %v499_v61 }
 0x206   :  { %v512_v3 = vadd.f32 %v511_v2, %v501_v1 }
 0x208   :  { %514 = vst.msk [vmem:[#allocation3] sm:$0x1] %vm513_vm0, %v512_v3 }
 0x209   :  { %626 = shalt.err (!%p623_p4)
}
 0x20a   :  { %s627_s30 = scalar_lea.hbm %s858_s9, 16 }
 0x20b   :  { %p628_p5 = scmp.ne.s32.totalorder %s858_s9, %s627_s30  ;;  %p631_p6 = scmp.lt.u32.totalorder %s627_s30, %s858_s9 }
 0x20d   :  { %p633_p7 = pnand %p631_p6, %p628_p5 }
 0x20f   :  { %636 = shalt.err (!%p633_p7)
}
 0x210   :  { %524 = dma.vmem_to_hbm [thread:$0]  %s522_s27, 16, %s858_s9, [#allocation4]  }
 0x211   :  { %637 = dma.done.wait [#allocation4], 16  }
 0x212   :  { %638 = vsyncadd [#allocation4], 4294967280 }
 0x213   :  { %528 = vsyncpa [#allocation4], 1 }

</bundles_post_ra>
